<compile_context>
chip_gen: v6e
topology: v6e:2x2x1
jax: 0.10.0
libtpu: 0.0.40
codegen_flags: <defaults>
</compile_context>

<pallas_src>
import jax
import jax.numpy as jnp
from jax.experimental import pallas as pl
from jax.experimental.pallas import tpu as pltpu

LANE = 128        # vreg lane width
SUBLANE_PAD = 16  # pad batch to a multiple of 16 (covers f32 sublane=8 and bf16 packing)


def _round_up(x, m):
    return (x + m - 1) // m * m


def _cdiv(a, b):
    return (a + b - 1) // b


# --------------------------------------------------------------------------- kernel
def qnetwork_kernel(x_ref, w1_ref, b1_ref, w2_ref, b2_ref, w3_ref, b3_ref, out_ref):
    """Fused forward for one batch tile: relu(x@W1+b1) -> relu(.@W2+b2) -> .@W3+b3.

    x arrives as f32 and is cast to bf16 here (hidden under the MXU slot); weights are
    pre-padded bf16; accumulation, bias add and ReLU are f32; the store is lane-dense
    bf16 (no masked vst.msk partial stores).
    """
    x = x_ref[...].astype(jnp.bfloat16)                                   # (TB, S)
    h = jnp.dot(x, w1_ref[...], preferred_element_type=jnp.float32) + b1_ref[...]
    h = jnp.maximum(h, 0.0).astype(jnp.bfloat16)                          # (TB, 128)
    h = jnp.dot(h, w2_ref[...], preferred_element_type=jnp.float32) + b2_ref[...]
    h = jnp.maximum(h, 0.0).astype(jnp.bfloat16)                          # (TB, 128)
    out = jnp.dot(h, w3_ref[...], preferred_element_type=jnp.float32) + b3_ref[...]
    out_ref[...] = out.astype(out_ref.dtype)                              # (TB, 128) unmasked vst


# ------------------------------------------------------------------ one-time param prep
def prepare_qnetwork_params(w1, b1, w2, b2, w3, b3):
    """Pad hidden/output widths to 128 lanes and cast matmul operands to bf16.

    Call ONCE at init (and after every parameter update), NOT per forward call.
    Weights are (in_features, out_features); biases (out_features,) or (1, out_features).
    Zero padding is mathematically exact (zero weight rows/cols, ReLU(0)=0).
    """
    state_size = w1.shape[0]
    h1, h2, act = w1.shape[1], w2.shape[1], w3.shape[1]
    h1p, h2p, actp = _round_up(h1, LANE), _round_up(h2, LANE), _round_up(act, LANE)

    w1p = jnp.zeros((state_size, h1p), jnp.bfloat16).at[:, :h1].set(w1.astype(jnp.bfloat16))
    b1p = jnp.zeros((1, h1p), jnp.float32).at[:, :h1].set(jnp.reshape(b1, (1, -1)))
    w2p = jnp.zeros((h1p, h2p), jnp.bfloat16).at[:h1, :h2].set(w2.astype(jnp.bfloat16))
    b2p = jnp.zeros((1, h2p), jnp.float32).at[:, :h2].set(jnp.reshape(b2, (1, -1)))
    w3p = jnp.zeros((h2p, actp), jnp.bfloat16).at[:h2, :act].set(w3.astype(jnp.bfloat16))
    b3p = jnp.zeros((1, actp), jnp.float32).at[:, :act].set(jnp.reshape(b3, (1, -1)))

    return {
        "w1": w1p, "b1": b1p,
        "w2": w2p, "b2": b2p,
        "w3": w3p, "b3": b3p,
        "action_size": act,           # static python int
    }


# ----------------------------------------------------------------------------- forward
def qnetwork_forward(state, params, *, block_batch=2048):
    """Fused QNetwork forward.

    state:  (batch, state_size) f32
    params: dict from prepare_qnetwork_params (close over it when jitting so
            `action_size` stays a static int).
    Returns (batch, action_size) f32.
    """
    batch, state_size = state.shape
    w1p, b1p = params["w1"], params["b1"]
    w2p, b2p = params["w2"], params["b2"]
    w3p, b3p = params["w3"], params["b3"]
    act = params["action_size"]
    h1p, h2p, actp = w1p.shape[1], w2p.shape[1], w3p.shape[1]

    # --- batch tiling ------------------------------------------------------------
    # Choose a tile count first (caps padding waste instead of rounding batch up to a
    # multiple of a huge tile), then derive the tile size.  Keep >= 2 grid steps when
    # the batch permits so v7x's two TensorCores both get work ("parallel" axis).
    bp0 = _round_up(batch, SUBLANE_PAD)
    n_tiles = max(_cdiv(bp0, block_batch), 1)
    if bp0 >= 2 * SUBLANE_PAD:
        n_tiles = max(n_tiles, 2)
    tb = _round_up(_cdiv(bp0, n_tiles), SUBLANE_PAD)
    bp = tb * n_tiles

    xs = state
    if bp != batch:
        xs = jnp.zeros((bp, state_size), state.dtype).at[:batch].set(state)

    out_padded = pl.pallas_call(
        qnetwork_kernel,
        out_shape=jax.ShapeDtypeStruct((bp, actp), jnp.bfloat16),
        grid_spec=pltpu.PrefetchScalarGridSpec(
            num_scalar_prefetch=0,
            grid=(n_tiles,),
            in_specs=[
                # state: streamed per batch tile (f32; cast to bf16 inside the kernel)
                pl.BlockSpec((tb, state_size), lambda i: (i, 0)),
                # weights/biases: constant index_map -> DMA'd once, VMEM-resident
                pl.BlockSpec((state_size, h1p), lambda i: (0, 0)),
                pl.BlockSpec((1, h1p), lambda i: (0, 0)),
                pl.BlockSpec((h1p, h2p), lambda i: (0, 0)),
                pl.BlockSpec((1, h2p), lambda i: (0, 0)),
                pl.BlockSpec((h2p, actp), lambda i: (0, 0)),
                pl.BlockSpec((1, actp), lambda i: (0, 0)),
            ],
            out_specs=pl.BlockSpec((tb, actp), lambda i: (i, 0)),
        ),
        compiler_params=pltpu.CompilerParams(
            dimension_semantics=("parallel",),  # batch tiles shard across v7x's 2 TCs
        ),
    )(xs, w1p, b1p, w2p, b2p, w3p, b3p)

    # Slice padded rows/lanes away and restore f32 Q-values (one tiny fused XLA op).
    return out_padded[:batch, :act].astype(jnp.float32)


# ------------------------------------------------------------------------------- init
def init_qnetwork_params(key, state_size, action_size, fc1_units=64, fc2_units=64):
    """PyTorch nn.Linear default init: U(-1/sqrt(fan_in), 1/sqrt(fan_in)).
    Weights stored transposed as (in_features, out_features); biases as (1, out)."""
    keys = jax.random.split(key, 6)

    def linear(kw, kb, fan_in, fan_out):
        bound = 1.0 / jnp.sqrt(jnp.float32(fan_in))
        w = jax.random.uniform(kw, (fan_in, fan_out), jnp.float32, -bound, bound)
        b = jax.random.uniform(kb, (1, fan_out), jnp.float32, -bound, bound)
        return w, b

    w1, b1 = linear(keys[0], keys[1], state_size, fc1_units)
    w2, b2 = linear(keys[2], keys[3], fc1_units, fc2_units)
    w3, b3 = linear(keys[4], keys[5], fc2_units, action_size)
    return w1, b1, w2, b2, w3, b3


if __name__ == "__main__":
    # Small shapes consistent with the module: batch=8, state_size=16, action_size=8,
    # hidden=64.  For real RL workloads, stack many env states into one big batch —
    # the batch grid + large tiles are where the kernel pays off.
    batch, state_size, action_size = 8, 16, 8
    key = jax.random.PRNGKey(0)
    k_params, k_state = jax.random.split(key)

    raw_params = init_qnetwork_params(k_params, state_size, action_size)
    state = jax.random.normal(k_state, (batch, state_size), dtype=jnp.float32)

    # One-time prep (hoisted out of the hot path), then a jitted forward that only
    # pads the batch (if needed) and launches the fused kernel.
    prepared = prepare_qnetwork_params(*raw_params)
    forward = jax.jit(lambda s: qnetwork_forward(s, prepared))

    q_values = forward(state)
    jax.block_until_ready(q_values)

    # f32 reference (same math). Kernel uses bf16 matmul operands + bf16 output store,
    # so tolerance is loosened accordingly.
    w1, b1, w2, b2, w3, b3 = raw_params
    r1 = jnp.maximum(state @ w1 + b1, 0.0)
    r2 = jnp.maximum(r1 @ w2 + b2, 0.0)
    ref = r2 @ w3 + b3

    assert q_values.shape == (batch, action_size)
    assert jnp.allclose(q_values, ref, atol=5e-2, rtol=5e-2), (
        f"max abs err {jnp.max(jnp.abs(q_values - ref))}")

    print("KERNEL_OK")
</pallas_src>

<mosaic_0001>
module attributes {stable_mosaic.version = 11 : i64} {
  func.func @qnetwork_kernel(%arg0: i32, %arg1: memref<16x16xf32, #tpu.memory_space<vmem>>, %arg2: memref<16x128xbf16, #tpu.memory_space<vmem>>, %arg3: memref<1x128xf32, #tpu.memory_space<vmem>>, %arg4: memref<128x128xbf16, #tpu.memory_space<vmem>>, %arg5: memref<1x128xf32, #tpu.memory_space<vmem>>, %arg6: memref<128x128xbf16, #tpu.memory_space<vmem>>, %arg7: memref<1x128xf32, #tpu.memory_space<vmem>>, %arg8: memref<16x128xbf16, #tpu.memory_space<vmem>>) attributes {dimension_semantics = [#tpu.dimension_semantics<parallel>], iteration_bounds = array<i64: 1>, scalar_prefetch = 0 : i64, scratch_operands = 0 : i64, tpu.core_type = #tpu.core_type<tc>, window_params = [{transform_indices = @transform_0, window_bounds = array<i64: 16, 16>}, {pipeline_mode = #tpu.pipeline_mode<synchronous>, transform_indices = @transform_1, window_bounds = array<i64: 16, 128>}, {pipeline_mode = #tpu.pipeline_mode<synchronous>, transform_indices = @transform_2, window_bounds = array<i64: 1, 128>}, {pipeline_mode = #tpu.pipeline_mode<synchronous>, transform_indices = @transform_3, window_bounds = array<i64: 128, 128>}, {pipeline_mode = #tpu.pipeline_mode<synchronous>, transform_indices = @transform_4, window_bounds = array<i64: 1, 128>}, {pipeline_mode = #tpu.pipeline_mode<synchronous>, transform_indices = @transform_5, window_bounds = array<i64: 128, 128>}, {pipeline_mode = #tpu.pipeline_mode<synchronous>, transform_indices = @transform_6, window_bounds = array<i64: 1, 128>}, {transform_indices = @transform_7, window_bounds = array<i64: 16, 128>}]} {
    %c0 = arith.constant 0 : index
    %c0_0 = arith.constant 0 : index
    %0 = vector.load %arg1[%c0, %c0_0] : memref<16x16xf32, #tpu.memory_space<vmem>>, vector<16x16xf32>
    %1 = arith.truncf %0 : vector<16x16xf32> to vector<16x16xbf16>
    %c0_1 = arith.constant 0 : index
    %c0_2 = arith.constant 0 : index
    %2 = vector.load %arg2[%c0_1, %c0_2] : memref<16x128xbf16, #tpu.memory_space<vmem>>, vector<16x128xbf16>
    %cst = arith.constant dense<0.000000e+00> : vector<16x128xf32>
    %3 = tpu.matmul %1, %2, %cst {dimension_numbers = #tpu.dot_dimension_numbers<[1], [0], [0], [1], [0, 0, 1, 1], [], []>} : vector<16x16xbf16>, vector<16x128xbf16>, vector<16x128xf32> -> vector<16x128xf32>
    %c0_3 = arith.constant 0 : index
    %c0_4 = arith.constant 0 : index
    %4 = vector.load %arg3[%c0_3, %c0_4] : memref<1x128xf32, #tpu.memory_space<vmem>>, vector<1x128xf32>
    %5 = vector.broadcast %4 : vector<1x128xf32> to vector<16x128xf32>
    %6 = arith.addf %3, %5 : vector<16x128xf32>
    %cst_5 = arith.constant 0.000000e+00 : f32
    %7 = vector.broadcast %cst_5 : f32 to vector<16x128xf32>
    %8 = arith.maximumf %6, %7 : vector<16x128xf32>
    %9 = arith.truncf %8 : vector<16x128xf32> to vector<16x128xbf16>
    %c0_6 = arith.constant 0 : index
    %c0_7 = arith.constant 0 : index
    %10 = vector.load %arg4[%c0_6, %c0_7] : memref<128x128xbf16, #tpu.memory_space<vmem>>, vector<128x128xbf16>
    %cst_8 = arith.constant dense<0.000000e+00> : vector<16x128xf32>
    %11 = tpu.matmul %9, %10, %cst_8 {dimension_numbers = #tpu.dot_dimension_numbers<[1], [0], [0], [1], [0, 0, 1, 1], [], []>} : vector<16x128xbf16>, vector<128x128xbf16>, vector<16x128xf32> -> vector<16x128xf32>
    %c0_9 = arith.constant 0 : index
    %c0_10 = arith.constant 0 : index
    %12 = vector.load %arg5[%c0_9, %c0_10] : memref<1x128xf32, #tpu.memory_space<vmem>>, vector<1x128xf32>
    %13 = vector.broadcast %12 : vector<1x128xf32> to vector<16x128xf32>
    %14 = arith.addf %11, %13 : vector<16x128xf32>
    %cst_11 = arith.constant 0.000000e+00 : f32
    %15 = vector.broadcast %cst_11 : f32 to vector<16x128xf32>
    %16 = arith.maximumf %14, %15 : vector<16x128xf32>
    %17 = arith.truncf %16 : vector<16x128xf32> to vector<16x128xbf16>
    %c0_12 = arith.constant 0 : index
    %c0_13 = arith.constant 0 : index
    %18 = vector.load %arg6[%c0_12, %c0_13] : memref<128x128xbf16, #tpu.memory_space<vmem>>, vector<128x128xbf16>
    %cst_14 = arith.constant dense<0.000000e+00> : vector<16x128xf32>
    %19 = tpu.matmul %17, %18, %cst_14 {dimension_numbers = #tpu.dot_dimension_numbers<[1], [0], [0], [1], [0, 0, 1, 1], [], []>} : vector<16x128xbf16>, vector<128x128xbf16>, vector<16x128xf32> -> vector<16x128xf32>
    %c0_15 = arith.constant 0 : index
    %c0_16 = arith.constant 0 : index
    %20 = vector.load %arg7[%c0_15, %c0_16] : memref<1x128xf32, #tpu.memory_space<vmem>>, vector<1x128xf32>
    %21 = vector.broadcast %20 : vector<1x128xf32> to vector<16x128xf32>
    %22 = arith.addf %19, %21 : vector<16x128xf32>
    %23 = arith.truncf %22 : vector<16x128xf32> to vector<16x128xbf16>
    %c0_17 = arith.constant 0 : index
    %c0_18 = arith.constant 0 : index
    %24 = vector.load %arg8[%c0_17, %c0_18] : memref<16x128xbf16, #tpu.memory_space<vmem>>, vector<16x128xbf16>
    tpu.vector_store %arg8[%c0_17, %c0_18], %23 {strides = array<i32>} : memref<16x128xbf16, #tpu.memory_space<vmem>>, vector<16x128xbf16>,
    return
  }
  func.func @transform_0(%arg0: i32) -> (i32, i32) {
    %c0_i32 = arith.constant 0 : i32
    %c0_i32_0 = arith.constant 0 : i32
    return %arg0, %c0_i32 : i32, i32
  }
  func.func @transform_1(%arg0: i32) -> (i32, i32) {
    %c0_i32 = arith.constant 0 : i32
    %c0_i32_0 = arith.constant 0 : i32
    %c0_i32_1 = arith.constant 0 : i32
    return %c0_i32, %c0_i32_0 : i32, i32
  }
  func.func @transform_2(%arg0: i32) -> (i32, i32) {
    %c0_i32 = arith.constant 0 : i32
    %c0_i32_0 = arith.constant 0 : i32
    %c0_i32_1 = arith.constant 0 : i32
    return %c0_i32, %c0_i32_0 : i32, i32
  }
  func.func @transform_3(%arg0: i32) -> (i32, i32) {
    %c0_i32 = arith.constant 0 : i32
    %c0_i32_0 = arith.constant 0 : i32
    %c0_i32_1 = arith.constant 0 : i32
    return %c0_i32, %c0_i32_0 : i32, i32
  }
  func.func @transform_4(%arg0: i32) -> (i32, i32) {
    %c0_i32 = arith.constant 0 : i32
    %c0_i32_0 = arith.constant 0 : i32
    %c0_i32_1 = arith.constant 0 : i32
    return %c0_i32, %c0_i32_0 : i32, i32
  }
  func.func @transform_5(%arg0: i32) -> (i32, i32) {
    %c0_i32 = arith.constant 0 : i32
    %c0_i32_0 = arith.constant 0 : i32
    %c0_i32_1 = arith.constant 0 : i32
    return %c0_i32, %c0_i32_0 : i32, i32
  }
  func.func @transform_6(%arg0: i32) -> (i32, i32) {
    %c0_i32 = arith.constant 0 : i32
    %c0_i32_0 = arith.constant 0 : i32
    %c0_i32_1 = arith.constant 0 : i32
    return %c0_i32, %c0_i32_0 : i32, i32
  }
  func.func @transform_7(%arg0: i32) -> (i32, i32) {
    %c0_i32 = arith.constant 0 : i32
    %c0_i32_0 = arith.constant 0 : i32
    return %arg0, %c0_i32 : i32, i32
  }
}

</mosaic_0001>

<bundles_post_ra>
// kernel: _lambda_.1
= control target key start
LH: loop header
LB: loop body
LE: loop exit
PB: predicated region body
PF: predicated region fallthrough
CT: control target
= control target key end

     0   :  { %12 = vsyncpa [#allocation3], 0  ;;  %s623_s0 = inlined_call_operand.vmem [shape: f32[16,16], index: 0, kind: input, shape index: {}]   ;;  %s624_s1 = inlined_call_operand.vmem [shape: bf16[16,128], index: 1, kind: input, shape index: {}]   ;;  %s625_s2 = inlined_call_operand.vmem [shape: f32[1,128], index: 2, kind: input, shape index: {}]   ;;  %s626_s3 = inlined_call_operand.hbm [shape: bf16[128,128], index: 3, kind: input, shape index: {}]   ;;  %s627_s4 = inlined_call_operand.vmem [shape: f32[1,128], index: 4, kind: input, shape index: {}]   ;;  %s628_s5 = inlined_call_operand.hbm [shape: bf16[128,128], index: 5, kind: input, shape index: {}]   ;;  %s629_s6 = inlined_call_operand.vmem [shape: f32[1,128], index: 6, kind: input, shape index: {}]   ;;  %s630_s7 = inlined_call_operand.vmem [shape: bf16[16,128], index: 7, kind: output, shape index: {}]  }
   0x1   :  { %13 = vsyncpa [#allocation5], 0  ;;  %s527_s24 = smov [#allocation2]  }
   0x2   :  { %s25_s25 = sshll.u32 %s527_s24, 4  ;;  %s26_s25 = int_to_ptr.vmem [resolvable:$true] %s25_s25 }
   0x3   :  { %s491_s26 = scalar_lea.vmem %s26_s25, 1024  ;;  %p496_p1 = scmp.lt.s32.totalorder %s26_s25, %s26_s25 }
   0x4   :  { %p492_p0 = scmp.ne.s32.totalorder %s26_s25, %s491_s26  ;;  %p497_p2 = scmp.lt.s32.totalorder %s491_s26, %s491_s26 }
   0x6   :  { %p498_p3 = por %p497_p2, %p496_p1 }
   0x8   :  { %p499_p4 = pnand %p498_p3, %p492_p0 }
   0xa   :  { %502 = shalt.err (!%p499_p4)
}
   0xb   :  { %s528_s27 = smov 64   ;;  %s529_s28 = smov 4  }
   0xc   :  { %31 = dma.hbm_to_vmem [thread:$0]  %s626_s3, 1024, %s26_s25, [#allocation3], %s528_s27, %s528_s27, %s529_s28  }
   0xd   :  { %s530_s8 = smov [#allocation4]  }
   0xe   :  { %s39_s9 = sshll.u32 %s530_s8, 4  ;;  %s40_s9 = int_to_ptr.vmem [resolvable:$true] %s39_s9 }
   0xf   :  { %s511_s10 = scalar_lea.vmem %s40_s9, 1024  ;;  %p516_p6 = scmp.lt.s32.totalorder %s40_s9, %s40_s9 }
  0x10   :  { %p512_p5 = scmp.ne.s32.totalorder %s40_s9, %s511_s10  ;;  %p517_p7 = scmp.lt.s32.totalorder %s511_s10, %s511_s10 }
  0x12   :  { %p518_p8 = por %p517_p7, %p516_p6 }
  0x14   :  { %p519_p9 = pnand %p518_p8, %p512_p5 }
  0x16   :  { %522 = shalt.err (!%p519_p9)
}
  0x17   :  { %45 = dma.hbm_to_vmem [thread:$0]  %s628_s5, 1024, %s40_s9, [#allocation5], %s528_s27, %s528_s27, %s529_s28  }
  0x18   :  { %523 = dma.done.wait [#allocation3], 1024  }
  0x19   :  { %524 = vsyncadd [#allocation3], 4294966272 }
  0x1a   :  { %525 = dma.done.wait [#allocation5], 1024  }
  0x1b   :  { %526 = vsyncadd [#allocation5], 4294966272  ;;  %v531_v0 = vmov 0.0   ;;  %vm532_vm0 = vmmov 0   ;;  %v466_v1 = vld [vmem:[%s624_s1] sm:$0xff]   ;;  %v56_v3 = vld [vmem:[%s623_s0 + $0x8] sm:$0xff] }
  0x1c   :  { %414 = vmatprep.subr.bf16.mxu0 %v531_v0  ;;  %416 = vmatprep.mubr.msk.bf16.mxu0 %vm532_vm0, %v531_v0  ;;  %v55_v2 = vld [vmem:[%s623_s0] sm:$0xff]  ;;  %vm73_vm1 = vcmask 130048   ;;  %v467_v5 = vld [vmem:[#allocation2 + $0x38] sm:$0xff]   ;;  %v468_v6 = vld [vmem:[#allocation2 + $0x30] sm:$0xff]  }
  0x1d   :  { %420 = vmatprep.subr.bf16.mxu1 %v531_v0  ;;  %436 = vmatprep.mubr.msk.bf16.mxu1 %vm532_vm0, %v531_v0  ;;  %v57_v4 = vpack.c.bf16 %v56_v3, %v55_v2  ;;  %v469_v7 = vld [vmem:[#allocation2 + $0x28] sm:$0xff]   ;;  %v470_v8 = vld [vmem:[#allocation2 + $0x20] sm:$0xff]   ;;  %v471_v9 = vld [vmem:[#allocation2 + $0x18] sm:$0xff]  }
  0x1e   :  { %415 = vmatpush3.bf16.msra.mxu0 %v466_v1  ;;  %421 = vmatpush3.bf16.msra.mxu1 %v467_v5  ;;  %v472_v10 = vld [vmem:[#allocation2 + $0x10] sm:$0xff]   ;;  %v473_v11 = vld [vmem:[#allocation2 + $0x8] sm:$0xff]   ;;  %v474_v12 = vld [vmem:[#allocation2] sm:$0xff]  }
  0x1f   :  { %440 = vmatprep.subr.bf16.mxu0 %v531_v0  ;;  %422 = vmatprep.subr.bf16.mxu1 %v531_v0  ;;  %v475_v13 = vld [vmem:[#allocation4 + $0x38] sm:$0xff]   ;;  %v476_v14 = vld [vmem:[#allocation4 + $0x30] sm:$0xff]   ;;  %v477_v15 = vld [vmem:[#allocation4 + $0x28] sm:$0xff]  }
  0x20   :  { %v478_v16 = vld [vmem:[#allocation4 + $0x20] sm:$0xff]   ;;  %v479_v17 = vld [vmem:[#allocation4 + $0x18] sm:$0xff]   ;;  %v480_v28 = vld [vmem:[#allocation4 + $0x10] sm:$0xff]  }
  0x21   :  { %417 = vmatmul.mubr.msk.bf16.vlgmr.msra.gmra.mxu0 %vm73_vm1, %v57_v4  ;;  %v364_v18 = vld [vmem:[%s625_s2] ss:$0 sm:$0xff]  ;;  %v481_v29 = vld [vmem:[#allocation4 + $0x8] sm:$0xff]  }
  0x22   :  { %456 = vmatprep.mubr.msk.bf16.mxu0 %vm532_vm0, %v531_v0  ;;  %423 = vmatpush3.bf16.msra.mxu1 %v468_v6  ;;  %v482_v30 = vld [vmem:[#allocation4] sm:$0xff]  }
  0x23   :  { %424 = vmatprep.subr.bf16.mxu1 %v531_v0  ;;  %441 = vmatpush3.bf16.msra.mxu0 %v475_v13  ;;  %v367_v31 = vld [vmem:[%s627_s4] ss:$0 sm:$0xff] }
  0x24   :  { %442 = vmatprep.subr.bf16.mxu0 %v531_v0  ;;  %v376_v42 = vld [vmem:[%s629_s6] ss:$0 sm:$0xff] }
  0x26   :  { %425 = vmatpush3.bf16.msra.mxu1 %v469_v7 }
  0x27   :  { %426 = vmatprep.subr.bf16.mxu1 %v531_v0  ;;  %443 = vmatpush3.bf16.msra.mxu0 %v476_v14 }
  0x28   :  { %444 = vmatprep.subr.bf16.mxu0 %v531_v0 }
  0x2a   :  { %427 = vmatpush3.bf16.msra.mxu1 %v470_v8 }
  0x2b   :  { %428 = vmatprep.subr.bf16.mxu1 %v531_v0  ;;  %445 = vmatpush3.bf16.msra.mxu0 %v477_v15 }
  0x2c   :  { %446 = vmatprep.subr.bf16.mxu0 %v531_v0 }
  0x2e   :  { %429 = vmatpush3.bf16.msra.mxu1 %v471_v9 }
  0x2f   :  { %430 = vmatprep.subr.bf16.mxu1 %v531_v0  ;;  %447 = vmatpush3.bf16.msra.mxu0 %v478_v16 }
  0x30   :  { %448 = vmatprep.subr.bf16.mxu0 %v531_v0 }
  0x32   :  { %431 = vmatpush3.bf16.msra.mxu1 %v472_v10 }
  0x33   :  { %432 = vmatprep.subr.bf16.mxu1 %v531_v0  ;;  %449 = vmatpush3.bf16.msra.mxu0 %v479_v17 }
  0x34   :  { %450 = vmatprep.subr.bf16.mxu0 %v531_v0 }
  0x36   :  { %433 = vmatpush3.bf16.msra.mxu1 %v473_v11 }
  0x37   :  { %434 = vmatprep.subr.bf16.mxu1 %v531_v0  ;;  %451 = vmatpush3.bf16.msra.mxu0 %v480_v28 }
  0x38   :  { %452 = vmatprep.subr.bf16.mxu0 %v531_v0 }
  0x3a   :  { %435 = vmatpush3.bf16.msra.mxu1 %v474_v12 }
  0x3b   :  { %453 = vmatpush3.bf16.msra.mxu0 %v481_v29 }
  0x3c   :  { %454 = vmatprep.subr.bf16.mxu0 %v531_v0 }
  0x3f   :  { %455 = vmatpush3.bf16.msra.mxu0 %v482_v30 }
  0xe1   :  { %v111_v19 = vpop.f32.mrf.mxu0 }
  0xe2   :  { %v112_v21 = vadd.f32 %v364_v18, %v111_v19 }
  0xe3   :  { %v418_v20 = vpop.f32.mrf.mxu0 }
  0xe4   :  { %v118_v25 = vmax.f32 %v112_v21, 0.0 }
  0xe5   :  { %v114_v22 = vpop.f32.mrf.mxu0 }
  0xe6   :  { %v115_v23 = vadd.f32 %v364_v18, %v114_v22 }
  0xe7   :  { %v419_v24 = vpop.f32.mrf.mxu0 }
  0xe8   :  { %v119_v26 = vmax.f32 %v115_v23, 0.0 }
  0xea   :  { %v120_v27 = vpack.c.bf16 %v119_v26, %v118_v25 }
  0xec   :  { %437 = vmatmul.mubr.bf16.vlgmr.msra.gmra.mxu1 %v120_v27 }
 0x1ac   :  { %v226_v32 = vpop.f32.mrf.mxu1 }
 0x1ad   :  { %v227_v34 = vadd.f32 %v367_v31, %v226_v32 }
 0x1ae   :  { %v438_v33 = vpop.f32.mrf.mxu1 }
 0x1af   :  { %v233_v38 = vmax.f32 %v227_v34, 0.0 }
 0x1b0   :  { %v229_v35 = vpop.f32.mrf.mxu1 }
 0x1b1   :  { %v230_v36 = vadd.f32 %v367_v31, %v229_v35 }
 0x1b2   :  { %v439_v37 = vpop.f32.mrf.mxu1 }
 0x1b3   :  { %v234_v39 = vmax.f32 %v230_v36, 0.0 }
 0x1b5   :  { %v235_v40 = vpack.c.bf16 %v234_v39, %v233_v38 }
 0x1b7   :  { %457 = vmatmul.mubr.bf16.vlgmr.msra.gmra.mxu0 %v235_v40 }
 0x277   :  { %v341_v41 = vpop.f32.mrf.mxu0 }
 0x278   :  { %v342_v45 = vadd.f32 %v376_v42, %v341_v41 }
 0x279   :  { %v458_v43 = vpop.f32.mrf.mxu0 }
 0x27b   :  { %v344_v44 = vpop.f32.mrf.mxu0 }
 0x27c   :  { %v345_v46 = vadd.f32 %v376_v42, %v344_v44 }
 0x27d   :  { %v459_v47 = vpop.f32.mrf.mxu0 }
 0x27e   :  { %v392_v48 = vpack.c.bf16 %v345_v46, %v342_v45 }
 0x280   :  { %393 = vst [vmem:[%s630_s7] sm:$0xff] %v392_v48  }
 0x281   :  { %362 = vsyncpa [#allocation3], 1 }
 0x282   :  { %363 = vsyncpa [#allocation5], 1 }

</bundles_post_ra>
